<compile_context>
chip_gen: v5e
topology: v5e:2x2
jax: 0.10.0
libtpu: 0.0.40
codegen_flags: <defaults>
</compile_context>

<pallas_src>
import jax
import jax.numpy as jnp
from jax.experimental import pallas as pl
from jax.experimental.pallas import tpu as pltpu


def _round_up(x, m):
    return (x + m - 1) // m * m


def discriminator_kernel(x_ref, a_ref, w1x_ref, w1a_ref, b1w2_ref, b2_ref, out_ref):
    # fc1 with the concat fused away: two small-K MXU dots, f32 accumulation.
    h = jnp.dot(x_ref[...].astype(jnp.bfloat16), w1x_ref[...],
                preferred_element_type=jnp.float32)
    h = h + jnp.dot(a_ref[...].astype(jnp.bfloat16), w1a_ref[...],
                    preferred_element_type=jnp.float32)
    b1 = b1w2_ref[0:1, :]                                   # (1, H) f32
    w2 = b1w2_ref[1:2, :]                                   # (1, H) f32
    h = jnp.maximum(h + b1, 0.0)                            # bias + ReLU (VPU), (TB, H)
    # fc2 has a single output unit: VPU multiply + lane (XLU) reduction,
    # not an N=1 MXU matmul.
    logit = jnp.sum(h * w2, axis=1, keepdims=True) + b2_ref[0, 0]   # (TB, 1)
    out_ref[...] = jax.nn.sigmoid(logit).astype(out_ref.dtype)


def discriminator_forward(x, a, params, *, block_b=4096):
    """x: (B, state_dim) f32, a: (B, action_dim) f32 -> (B, 1) f32 probabilities."""
    w1, b1, w2, b2 = params          # torch-native shapes: (H,S+A), (H,), (1,H), (1,)
    B, S = x.shape
    A = a.shape[1]
    H = w1.shape[0]

    # Tiny grid-invariant weight prep (negligible vs streaming x/a from HBM).
    w1x_t = w1[:, :S].T.astype(jnp.bfloat16)                       # (S, H)
    w1a_t = w1[:, S:].T.astype(jnp.bfloat16)                       # (A, H)
    b1w2 = jnp.stack([b1, w2[0]], axis=0).astype(jnp.float32)      # (2, H)
    b2_s = b2.reshape(1, 1).astype(jnp.float32)                    # SMEM scalar

    # Large batch tile (4k-16k range), but keep >= 2 grid steps when possible
    # so both v7x TensorCores get work; always a multiple of 8 sublanes.
    tb = max(8, min(block_b, _round_up(pl.cdiv(B, 2), 8)))
    grid = (pl.cdiv(B, tb),)

    out = pl.pallas_call(
        discriminator_kernel,
        out_shape=jax.ShapeDtypeStruct((B, 1), jnp.float32),
        grid=grid,
        in_specs=[
            pl.BlockSpec((tb, S), lambda i: (i, 0)),               # x batch tile
            pl.BlockSpec((tb, A), lambda i: (i, 0)),               # a batch tile
            pl.BlockSpec((S, H), lambda i: (0, 0)),                # W1x^T (invariant)
            pl.BlockSpec((A, H), lambda i: (0, 0)),                # W1a^T (invariant)
            pl.BlockSpec((2, H), lambda i: (0, 0)),                # [b1; w2] rows
            pl.BlockSpec(memory_space=pltpu.MemorySpace.SMEM),     # b2 scalar
        ],
        out_specs=pl.BlockSpec((tb, 1), lambda i: (i, 0)),
        compiler_params=pltpu.CompilerParams(
            dimension_semantics=("parallel",),
        ),
    )(x, a, w1x_t, w1a_t, b1w2, b2_s)

    return out


def init_params(key, state_dim, hidden_dim, action_dim):
    """nn.Linear-style init, torch-native shapes.

    fc1: Linear(state_dim + action_dim, hidden) -> W1 (H, S+A), b1 (H,)
    fc2: Linear(hidden, 1)                      -> W2 (1, H),   b2 (1,)
    """
    k1, k2, k3, k4 = jax.random.split(key, 4)
    in1 = state_dim + action_dim
    bound1 = 1.0 / jnp.sqrt(in1)
    bound2 = 1.0 / jnp.sqrt(hidden_dim)
    w1 = jax.random.uniform(k1, (hidden_dim, in1), jnp.float32, -bound1, bound1)
    b1 = jax.random.uniform(k2, (hidden_dim,), jnp.float32, -bound1, bound1)
    w2 = jax.random.uniform(k3, (1, hidden_dim), jnp.float32, -bound2, bound2)
    b2 = jax.random.uniform(k4, (1,), jnp.float32, -bound2, bound2)
    return w1, b1, w2, b2


def reference_forward(x, a, params):
    w1, b1, w2, b2 = params
    cat = jnp.concatenate([x, a], axis=1)
    # Mirror the kernel's bf16 quantization of activations and W1 (f32 accum).
    cat = cat.astype(jnp.bfloat16).astype(jnp.float32)
    w1f = w1.astype(jnp.bfloat16).astype(jnp.float32)
    h = jax.nn.relu(cat @ w1f.T + b1)
    logit = jnp.sum(h * w2[0], axis=1, keepdims=True) + b2
    return jax.nn.sigmoid(logit)


if __name__ == "__main__":
    key = jax.random.PRNGKey(0)
    kx, ka, kp = jax.random.split(key, 3)

    # Small shapes; B=200 still exercises a 2-step grid and a ragged last tile.
    B, state_dim, action_dim, hidden_dim = 200, 8, 4, 32
    x = jax.random.normal(kx, (B, state_dim), jnp.float32)
    a = jax.random.normal(ka, (B, action_dim), jnp.float32)
    params = init_params(kp, state_dim, hidden_dim, action_dim)

    out = discriminator_forward(x, a, params)
    out = jax.block_until_ready(out)

    ref = reference_forward(x, a, params)
    assert out.shape == (B, 1), out.shape
    assert jnp.allclose(out, ref, atol=1e-3, rtol=1e-3), (out, ref)

    print("KERNEL_OK")
</pallas_src>

<mosaic_0001>
module attributes {stable_mosaic.version = 11 : i64} {
  func.func @discriminator_kernel(%arg0: i32, %arg1: memref<104x8xf32, #tpu.memory_space<vmem>>, %arg2: memref<104x4xf32, #tpu.memory_space<vmem>>, %arg3: memref<8x32xbf16, #tpu.memory_space<vmem>>, %arg4: memref<4x32xbf16, #tpu.memory_space<vmem>>, %arg5: memref<2x32xf32, #tpu.memory_space<vmem>>, %arg6: memref<1x1xf32, #tpu.memory_space<smem>>, %arg7: memref<104x1xf32, #tpu.memory_space<vmem>>) attributes {dimension_semantics = [#tpu.dimension_semantics<parallel>], iteration_bounds = array<i64: 2>, scalar_prefetch = 0 : i64, scratch_operands = 0 : i64, tpu.core_type = #tpu.core_type<tc>, window_params = [{transform_indices = @transform_0, window_bounds = array<i64: 104, 8>}, {transform_indices = @transform_1, window_bounds = array<i64: 104, 4>}, {pipeline_mode = #tpu.pipeline_mode<synchronous>, transform_indices = @transform_2, window_bounds = array<i64: 8, 32>}, {pipeline_mode = #tpu.pipeline_mode<synchronous>, transform_indices = @transform_3, window_bounds = array<i64: 4, 32>}, {pipeline_mode = #tpu.pipeline_mode<synchronous>, transform_indices = @transform_4, window_bounds = array<i64: 2, 32>}, {transform_indices = @transform_5, window_bounds = array<i64: 1, 1>}, {transform_indices = @transform_6, window_bounds = array<i64: 104, 1>}]} {
    %c0 = arith.constant 0 : index
    %c0_0 = arith.constant 0 : index
    %0 = vector.load %arg1[%c0, %c0_0] : memref<104x8xf32, #tpu.memory_space<vmem>>, vector<104x8xf32>
    %1 = arith.truncf %0 : vector<104x8xf32> to vector<104x8xbf16>
    %c0_1 = arith.constant 0 : index
    %c0_2 = arith.constant 0 : index
    %2 = vector.load %arg3[%c0_1, %c0_2] : memref<8x32xbf16, #tpu.memory_space<vmem>>, vector<8x32xbf16>
    %cst = arith.constant dense<0.000000e+00> : vector<104x32xf32>
    %3 = tpu.matmul %1, %2, %cst {dimension_numbers = #tpu.dot_dimension_numbers<[1], [0], [0], [1], [0, 0, 1, 1], [], []>} : vector<104x8xbf16>, vector<8x32xbf16>, vector<104x32xf32> -> vector<104x32xf32>
    %c0_3 = arith.constant 0 : index
    %c0_4 = arith.constant 0 : index
    %4 = vector.load %arg2[%c0_3, %c0_4] : memref<104x4xf32, #tpu.memory_space<vmem>>, vector<104x4xf32>
    %5 = arith.truncf %4 : vector<104x4xf32> to vector<104x4xbf16>
    %c0_5 = arith.constant 0 : index
    %c0_6 = arith.constant 0 : index
    %6 = vector.load %arg4[%c0_5, %c0_6] : memref<4x32xbf16, #tpu.memory_space<vmem>>, vector<4x32xbf16>
    %cst_7 = arith.constant dense<0.000000e+00> : vector<104x32xf32>
    %7 = tpu.matmul %5, %6, %cst_7 {dimension_numbers = #tpu.dot_dimension_numbers<[1], [0], [0], [1], [0, 0, 1, 1], [], []>} : vector<104x4xbf16>, vector<4x32xbf16>, vector<104x32xf32> -> vector<104x32xf32>
    %8 = arith.addf %3, %7 : vector<104x32xf32>
    %c0_8 = arith.constant 0 : index
    %c0_9 = arith.constant 0 : index
    %9 = vector.load %arg5[%c0_8, %c0_9] : memref<2x32xf32, #tpu.memory_space<vmem>>, vector<1x32xf32>
    %c1 = arith.constant 1 : index
    %c0_10 = arith.constant 0 : index
    %10 = vector.load %arg5[%c1, %c0_10] : memref<2x32xf32, #tpu.memory_space<vmem>>, vector<1x32xf32>
    %11 = vector.broadcast %9 : vector<1x32xf32> to vector<104x32xf32>
    %12 = arith.addf %8, %11 : vector<104x32xf32>
    %cst_11 = arith.constant 0.000000e+00 : f32
    %13 = vector.broadcast %cst_11 : f32 to vector<104x32xf32>
    %14 = arith.maximumf %12, %13 : vector<104x32xf32>
    %15 = vector.broadcast %10 : vector<1x32xf32> to vector<104x32xf32>
    %16 = arith.mulf %14, %15 : vector<104x32xf32>
    %cst_12 = arith.constant dense<0.000000e+00> : vector<104xf32>
    %17 = vector.multi_reduction <add>, %16, %cst_12 [1] : vector<104x32xf32> to vector<104xf32>
    %18 = vector.shape_cast %17 : vector<104xf32> to vector<104x1xf32>
    %c0_13 = arith.constant 0 : index
    %c0_14 = arith.constant 0 : index
    %19 = memref.load %arg6[%c0_13, %c0_14] : memref<1x1xf32, #tpu.memory_space<smem>>
    %20 = vector.broadcast %19 : f32 to vector<104x1xf32>
    %21 = arith.addf %18, %20 : vector<104x1xf32>
    %22 = arith.negf %21 : vector<104x1xf32>
    %23 = math.exp %22 : vector<104x1xf32>
    %cst_15 = arith.constant 1.000000e+00 : f32
    %24 = vector.broadcast %cst_15 : f32 to vector<104x1xf32>
    %25 = arith.addf %24, %23 : vector<104x1xf32>
    %26 = arith.divf %24, %25 : vector<104x1xf32>
    %c0_16 = arith.constant 0 : index
    %c0_17 = arith.constant 0 : index
    %27 = vector.load %arg7[%c0_16, %c0_17] : memref<104x1xf32, #tpu.memory_space<vmem>>, vector<104x1xf32>
    tpu.vector_store %arg7[%c0_16, %c0_17], %26 {strides = array<i32>} : memref<104x1xf32, #tpu.memory_space<vmem>>, vector<104x1xf32>,
    return
  }
  func.func @transform_0(%arg0: i32) -> (i32, i32) {
    %c0_i32 = arith.constant 0 : i32
    %c0_i32_0 = arith.constant 0 : i32
    return %arg0, %c0_i32 : i32, i32
  }
  func.func @transform_1(%arg0: i32) -> (i32, i32) {
    %c0_i32 = arith.constant 0 : i32
    %c0_i32_0 = arith.constant 0 : i32
    return %arg0, %c0_i32 : i32, i32
  }
  func.func @transform_2(%arg0: i32) -> (i32, i32) {
    %c0_i32 = arith.constant 0 : i32
    %c0_i32_0 = arith.constant 0 : i32
    %c0_i32_1 = arith.constant 0 : i32
    return %c0_i32, %c0_i32_0 : i32, i32
  }
  func.func @transform_3(%arg0: i32) -> (i32, i32) {
    %c0_i32 = arith.constant 0 : i32
    %c0_i32_0 = arith.constant 0 : i32
    %c0_i32_1 = arith.constant 0 : i32
    return %c0_i32, %c0_i32_0 : i32, i32
  }
  func.func @transform_4(%arg0: i32) -> (i32, i32) {
    %c0_i32 = arith.constant 0 : i32
    %c0_i32_0 = arith.constant 0 : i32
    %c0_i32_1 = arith.constant 0 : i32
    return %c0_i32, %c0_i32_0 : i32, i32
  }
  func.func @transform_5(%arg0: i32) -> (i32, i32) {
    %c0_i32 = arith.constant 0 : i32
    %c0_i32_0 = arith.constant 0 : i32
    %c0_i32_1 = arith.constant 0 : i32
    return %c0_i32, %c0_i32_0 : i32, i32
  }
  func.func @transform_6(%arg0: i32) -> (i32, i32) {
    %c0_i32 = arith.constant 0 : i32
    %c0_i32_0 = arith.constant 0 : i32
    return %arg0, %c0_i32 : i32, i32
  }
}

</mosaic_0001>

<bundles_post_ra>
// kernel: tpu_custom_call.1
= control target key start
LH: loop header
LB: loop body
LE: loop exit
PB: predicated region body
PF: predicated region fallthrough
CT: control target
= control target key end

     0   :  { %s1778_s0 = inlined_call_operand.vmem [shape: f32[200,8], index: 0, kind: input, shape index: {}]   ;;  %s1779_s1 = inlined_call_operand.vmem [shape: f32[200,4], index: 1, kind: input, shape index: {}]   ;;  %s1780_s2 = inlined_call_operand.vmem [shape: bf16[8,32], index: 2, kind: input, shape index: {}]   ;;  %s1781_s3 = inlined_call_operand.vmem [shape: bf16[4,32], index: 3, kind: input, shape index: {}]   ;;  %s1782_s4 = inlined_call_operand.vmem [shape: f32[2,32], index: 4, kind: input, shape index: {}]   ;;  %s1783_s5 = inlined_call_operand.<no memory space> [shape: f32[1,1], index: 5, kind: input, shape index: {}]   ;;  %s1784_s6 = inlined_call_operand.vmem [shape: f32[200,1], index: 6, kind: output, shape index: {}]  }
   0x1   :  { %11 = sst [smem:[#allocation2]] %s1783_s5 }
   0x2   :  { %s1458_s23 = smov 0   ;;  %s1460_s24 = smov 0  }
   0x3   :  { %s1462_s25 = smov 0  }
   0x4 LB: > { %s1471_s5 = sadd.s32 4294967295, %s1386_s25   ;;  %s1473_s26 = sadd.s32 1, %s1386_s25   ;;  %s1386_s25 = sphi %s1462_s25, %s1797_s25   ;;  %s1382_s24 = sphi %s1460_s24, %s1796_s24   ;;  %s1378_s23 = sphi %s1458_s23, %s1795_s23  }
   0x5   : > { %s157_s27 = ssub.s32 %s1386_s25, %s1473_s26  ;;  %s160_s28 = sadd.s32 1, %s1382_s24 }
   0x6   : > { %p158_p0 = scmp.eq.s32.totalorder %s157_s27, 0  ;;  %p170_p1 = scmp.ne.s32.totalorder %s1382_s24, %s1378_s23 }
   0x7   : > { %p171_p2 = scmp.eq.s32.totalorder %s1471_s5, 1  ;;  %p1137_p3 = scmp.ge.s32.totalorder %s1386_s25, 1 }
   0x8   : > { %s1481_s29 = scalar_select %p158_p0, %s1382_s24, %s160_s28  }
   0x9   : > { %p1483_p4 = por %p171_p2, %p170_p1  ;;  %p241_p5 = scmp.lt.s32.totalorder %s1386_s25, 3 }
   0xb   : > { %p242_p6 = pnand %p1137_p3, %p241_p5 }
   0xc   : > { %s1494_s11 = smul.u32 (!%p242_p6), 13, %s1471_s5  ;;  %s580_s27 = sld [smem:[#allocation2]] (!%p242_p6) }
   0xd   : > { %245 = sbr.rel (%p242_p6) target bundleno = 434 (0x1b2), region = 44  ;;  %s280_s28 = sand.u32 (!%p242_p6), 1, %s1378_s23  }
   0xe   : > { %p288_p7 = scmp.lt.s32.totalorder (!%p242_p6), %s1494_s11, 24  ;;  %s1182_s7 = smul.u32 (!%p242_p6), 104, %s280_s28 }
  0x10   : > { %s1613_s23 = scalar_lea.vmem (!%p242_p6), [#allocation3], %s1182_s7  }
  0x12   : > { %v358_v0 = vld [vmem:[%s1781_s3] sm:$0x3]  ;;  %vm381_vm0 = vcmask 1041408   ;;  %vm450_vm1 = vcmask 1043456   ;;  %s289_s12 = scalar_select %p288_p7, %s1494_s11, 24  ;;  %vm359_vm2 = vcmask 31744  }
  0x13   : > { %v337_v1 = vld [vmem:[%s1780_s2] sm:$0xf]  ;;  %v383_v2 = vsel %vm381_vm0, %v358_v0, 0  ;;  %vm428_vm3 = vcmask 64512   ;;  %vm540_vm4 = vcmask 261120   ;;  %vm842_vm7 = vcmask 7168  }
  0x14   : > { %v452_v3 = vsel %vm450_vm1, %v337_v1, 0  ;;  %392 = vmatpush.bf16.msra.mxu0 %v383_v2  ;;  %1180 = vmatpush.bf16.msra.mxu2 %v383_v2  ;;  %s1138_s13 = sshll.u32 %s289_s12, 3  ;;  %v1551_v45 = vld [vmem:[%s1782_s4] ss:$0 sm:$0xff]  ;;  %v1557_v49 = vld [vmem:[%s1782_s4 + $0x1] ss:$0 sm:$0xff] }
  0x15   : > { %461 = vmatpush.bf16.msra.mxu1 %v452_v3  ;;  %1181 = vmatpush.bf16.msra.mxu3 %v452_v3  ;;  %s1501_s16 = scalar_lea.vmem %s1779_s1, %s1138_s13  ;;  %s1506_s19 = scalar_lea.vmem %s1778_s0, %s1138_s13 }
  0x16   : > { %v338_v4 = vld [vmem:[%s1501_s16] sm:$0xff]  ;;  %v339_v5 = vld [vmem:[%s1501_s16 + $0x8] sm:$0xff]  ;;  %v340_v16 = vld [vmem:[%s1501_s16 + $0x10] sm:$0xff]  ;;  %s864_s8 = ssub.s32 (%p1483_p4), 25, %s1494_s11  ;;  %s1179_s9 = smul.u32 (%p1483_p4), 104, %s1471_s5 }
  0x17   : > { %v317_v6 = vld [vmem:[%s1506_s19] sm:$0xff]  ;;  %v351_v7 = vpack.c.bf16 %v339_v5, %v338_v4  ;;  %v318_v8 = vld [vmem:[%s1506_s19 + $0x8] sm:$0xff]  ;;  %v341_v17 = vld [vmem:[%s1501_s16 + $0x18] sm:$0xff]  ;;  %p865_p8 = scmp.lt.s32.totalorder (%p1483_p4), %s864_s8, 13 }
  0x18   : > { %v346_v9 = vld [vmem:[%s1501_s16 + $0x40] sm:$0xff]  ;;  %v347_v10 = vld [vmem:[%s1501_s16 + $0x48] sm:$0xff]  ;;  %v330_v11 = vpack.c.bf16 %v318_v8, %v317_v6  ;;  %v319_v18 = vld [vmem:[%s1506_s19 + $0x10] sm:$0xff]  ;;  %v352_v24 = vpack.c.bf16 %v341_v17, %v340_v16  ;;  %s1692_s13 = scalar_lea.vmem (%p1483_p4), %s1784_s6, %s1179_s9  }
  0x19   : > { %v355_v12 = vpack.c.bf16 %v347_v10, %v346_v9  ;;  %v325_v13 = vld [vmem:[%s1506_s19 + $0x40] sm:$0xff]  ;;  %v326_v14 = vld [vmem:[%s1506_s19 + $0x48] sm:$0xff]  ;;  %1140 = vmatmul.msk.bf16.vlgmr.msra.gmra.mxu0 %vm359_vm2, %v351_v7  ;;  %v320_v19 = vld [vmem:[%s1506_s19 + $0x18] sm:$0xff] }
  0x1a   : > { %v334_v15 = vpack.c.bf16 %v326_v14, %v325_v13  ;;  %1147 = vmatmul.msk.bf16.vlgmr.msra.gmra.mxu1 %vm428_vm3, %v330_v11  ;;  %v348_v20 = vld [vmem:[%s1501_s16 + $0x50] sm:$0xff]  ;;  %v349_v21 = vld [vmem:[%s1501_s16 + $0x58] sm:$0xff]  ;;  %v331_v25 = vpack.c.bf16 %v320_v19, %v319_v18  ;;  %v342_v28 = vld [vmem:[%s1501_s16 + $0x20] sm:$0xff] }
  0x1b   : > { %1144 = vmatmul.msk.bf16.vlgmr.msra.gmra.mxu2 %vm359_vm2, %v355_v12  ;;  %v327_v22 = vld [vmem:[%s1506_s19 + $0x50] sm:$0xff]  ;;  %v328_v23 = vld [vmem:[%s1506_s19 + $0x58] sm:$0xff]  ;;  %v356_v26 = vpack.c.bf16 %v349_v21, %v348_v20  ;;  %v343_v29 = vld [vmem:[%s1501_s16 + $0x28] sm:$0xff] }
  0x1c   : > { %1151 = vmatmul.msk.bf16.vlgmr.msra.gmra.mxu3 %vm428_vm3, %v334_v15  ;;  %v335_v27 = vpack.c.bf16 %v328_v23, %v327_v22  ;;  %v321_v30 = vld [vmem:[%s1506_s19 + $0x20] sm:$0xff]  ;;  %v322_v31 = vld [vmem:[%s1506_s19 + $0x28] sm:$0xff]  ;;  %v353_v34 = vpack.c.bf16 %v343_v29, %v342_v28  ;;  %v344_v38 = vld [vmem:[%s1501_s16 + $0x30] sm:$0xff] }
  0x1d   : > { %v350_v32 = vld [vmem:[%s1501_s16 + $0x60] sm:$0xff]  ;;  %v332_v35 = vpack.c.bf16 %v322_v31, %v321_v30  ;;  %v345_v39 = vld [vmem:[%s1501_s16 + $0x38] sm:$0xff]  ;;  %v323_v40 = vld [vmem:[%s1506_s19 + $0x30] sm:$0xff] }
  0x1e   : > { %v329_v33 = vld [vmem:[%s1506_s19 + $0x60] sm:$0xff]  ;;  %v357_v36 = vpack.c.bf16 %v350_v32, %v350_v32  ;;  %v324_v41 = vld [vmem:[%s1506_s19 + $0x38] sm:$0xff]  ;;  %v354_v42 = vpack.c.bf16 %v345_v39, %v344_v38 }
  0x1f   : > { %v336_v37 = vpack.c.bf16 %v329_v33, %v329_v33  ;;  %v333_v43 = vpack.c.bf16 %v324_v41, %v323_v40 }
  0x29   : > { %1141 = vmatmul.msk.bf16.gmra.mxu0 %vm359_vm2, %v352_v24 }
  0x2a   : > { %1148 = vmatmul.msk.bf16.gmra.mxu1 %vm428_vm3, %v331_v25 }
  0x2b   : > { %1145 = vmatmul.msk.bf16.gmra.mxu2 %vm359_vm2, %v356_v26 }
  0x2c   : > { %1152 = vmatmul.msk.bf16.gmra.mxu3 %vm428_vm3, %v335_v27 }
  0x39   : > { %1142 = vmatmul.msk.bf16.gmra.mxu0 %vm359_vm2, %v353_v34 }
  0x3a   : > { %1149 = vmatmul.msk.bf16.gmra.mxu1 %vm428_vm3, %v332_v35 }
  0x3b   : > { %1146 = vmatmul.msk.bf16.gmra.mxu2 %vm359_vm2, %v357_v36 }
  0x3c   : > { %1153 = vmatmul.msk.bf16.gmra.mxu3 %vm428_vm3, %v336_v37 }
  0x49   : > { %1143 = vmatmul.msk.bf16.gmra.mxu0 %vm359_vm2, %v354_v42 }
  0x4a   : > { %1150 = vmatmul.msk.bf16.gmra.mxu1 %vm428_vm3, %v333_v43 }
  0x96   : > { %v394_v44 = vpop.f32.mrf.mxu0 }
  0x97   : > { %v463_v46 = vpop.f32.mrf.mxu1 }
  0x98   : > { %v464_v47 = vadd.f32 %v463_v46, %v394_v44 }
  0x9a   : > { %v500_v48 = vadd.f32 %v1551_v45, %v464_v47 }
  0x9c   : > { %v513_v50 = vmax.f32 %v500_v48, 0.0 }
  0x9e   : > { %v414_v51 = vpop.f32.mrf.mxu2  ;;  %v396_v52 = vpop.f32.mrf.mxu0  ;;  %v527_v53 = vmul.f32 %v1557_v49, %v513_v50 }
  0x9f   : > { %v483_v54 = vpop.f32.mrf.mxu3  ;;  %v465_v55 = vpop.f32.mrf.mxu1 }
  0xa0   : > { %v484_v56 = vadd.f32 %v483_v54, %v414_v51  ;;  %v466_v57 = vadd.f32 %v465_v55, %v396_v52  ;;  %v541_v58 = vsel %vm540_vm4, %v527_v53, 0.0 }
  0xa1   : > { %542 = vadd.xlane.f32.xlu0 %v541_v58 }
  0xa2   : > { %v508_v59 = vadd.f32 %v1551_v45, %v484_v56  ;;  %v501_v60 = vadd.f32 %v1551_v45, %v466_v57 }
  0xa4   : > { %v521_v61 = vmax.f32 %v508_v59, 0.0  ;;  %v514_v62 = vmax.f32 %v501_v60, 0.0 }
  0xa6   : > { %v416_v63 = vpop.f32.mrf.mxu2  ;;  %v535_v0 = vmul.f32 %v1557_v49, %v521_v61  ;;  %v399_v1 = vpop.f32.mrf.mxu0  ;;  %v528_v2 = vmul.f32 %v1557_v49, %v514_v62 }
  0xa7   : > { %v485_v3 = vpop.f32.mrf.mxu3  ;;  %v468_v4 = vpop.f32.mrf.mxu1 }
  0xa8   : > { %v486_v5 = vadd.f32 %v485_v3, %v416_v63  ;;  %v565_v6 = vsel %vm540_vm4, %v535_v0, 0.0  ;;  %v469_v7 = vadd.f32 %v468_v4, %v399_v1  ;;  %v544_v8 = vsel %vm540_vm4, %v528_v2, 0.0 }
  0xa9   : > { %566 = vadd.xlane.f32.xlu2 %v565_v6  ;;  %545 = vadd.xlane.f32.xlu0 %v544_v8 }
  0xaa   : > { %v509_v9 = vadd.f32 %v1551_v45, %v486_v5  ;;  %v502_v10 = vadd.f32 %v1551_v45, %v469_v7 }
  0xac   : > { %v522_v11 = vmax.f32 %v509_v9, 0.0  ;;  %v515_v12 = vmax.f32 %v502_v10, 0.0 }
  0xae   : > { %v536_v13 = vmul.f32 %v1557_v49, %v522_v11  ;;  %v419_v14 = vpop.f32.mrf.mxu2  ;;  %v401_v15 = vpop.f32.mrf.mxu0  ;;  %v529_v16 = vmul.f32 %v1557_v49, %v515_v12 }
  0xaf   : > { %v488_v17 = vpop.f32.mrf.mxu3  ;;  %v470_v18 = vpop.f32.mrf.mxu1 }
  0xb0   : > { %v568_v19 = vsel %vm540_vm4, %v536_v13, 0.0  ;;  %v489_v20 = vadd.f32 %v488_v17, %v419_v14  ;;  %v471_v21 = vadd.f32 %v470_v18, %v401_v15  ;;  %v547_v22 = vsel %vm540_vm4, %v529_v16, 0.0 }
  0xb1   : > { %548 = vadd.xlane.f32.xlu1 %v547_v22  ;;  %569 = vadd.xlane.f32.xlu0 %v568_v19  ;;  %v1597_v13 = vstv %s580_s27 }
  0xb2   : > { %v510_v23 = vadd.f32 %v1551_v45, %v489_v20  ;;  %v503_v24 = vadd.f32 %v1551_v45, %v471_v21 }
  0xb4   : > { %v523_v25 = vmax.f32 %v510_v23, 0.0  ;;  %v516_v26 = vmax.f32 %v503_v24, 0.0 }
  0xb6   : > { %v421_v27 = vpop.f32.mrf.mxu2  ;;  %v537_v28 = vmul.f32 %v1557_v49, %v523_v25  ;;  %v404_v29 = vpop.f32.mrf.mxu0  ;;  %v530_v30 = vmul.f32 %v1557_v49, %v516_v26 }
  0xb7   : > { %v490_v31 = vpop.f32.mrf.mxu3  ;;  %v473_v32 = vpop.f32.mrf.mxu1 }
  0xb8   : > { %v571_v33 = vsel %vm540_vm4, %v537_v28, 0.0  ;;  %v474_v34 = vadd.f32 %v473_v32, %v404_v29  ;;  %v550_v35 = vsel %vm540_vm4, %v530_v30, 0.0  ;;  %v491_v41 = vadd.f32 %v490_v31, %v421_v27 }
  0xb9   : > { %551 = vadd.xlane.f32.xlu1 %v550_v35 }
  0xba   : > { %v504_v36 = vadd.f32 %v1551_v45, %v474_v34  ;;  %v511_v48 = vadd.f32 %v1551_v45, %v491_v41 }
  0xbc   : > { %v517_v37 = vmax.f32 %v504_v36, 0.0  ;;  %v524_v53 = vmax.f32 %v511_v48, 0.0 }
  0xbe   : > { %v424_v38 = vpop.f32.mrf.mxu2  ;;  %v406_v39 = vpop.f32.mrf.mxu0  ;;  %v531_v40 = vmul.f32 %v1557_v49, %v517_v37  ;;  %v538_v62 = vmul.f32 %v1557_v49, %v524_v53 }
  0xbf   : > { %v493_v42 = vpop.f32.mrf.mxu3  ;;  %v475_v43 = vpop.f32.mrf.mxu1 }
  0xc0   : > { %v476_v44 = vadd.f32 %v475_v43, %v406_v39  ;;  %v553_v46 = vsel %vm540_vm4, %v531_v40, 0.0  ;;  %v494_v55 = vadd.f32 %v493_v42, %v424_v38  ;;  %v574_v2 = vsel %vm540_vm4, %v538_v62, 0.0 }
  0xc1   : > { %554 = vadd.xlane.f32.xlu2 %v553_v46 }
  0xc2   : > { %v505_v47 = vadd.f32 %v1551_v45, %v476_v44  ;;  %v512_v61 = vadd.f32 %v1551_v45, %v494_v55 }
  0xc4   : > { %v518_v50 = vmax.f32 %v505_v47, 0.0  ;;  %v525_v1 = vmax.f32 %v512_v61, 0.0 }
  0xc6   : > { %v426_v51 = vpop.f32.mrf.mxu2  ;;  %v409_v52 = vpop.f32.mrf.mxu0  ;;  %v532_v54 = vmul.f32 %v1557_v49, %v518_v50  ;;  %v539_v8 = vmul.f32 %v1557_v49, %v525_v1 }
  0xc7   : > { %v495_v56 = vpop.f32.mrf.mxu3  ;;  %v478_v57 = vpop.f32.mrf.mxu1 }
  0xc8   : > { %v479_v58 = vadd.f32 %v478_v57, %v409_v52  ;;  %v556_v59 = vsel %vm540_vm4, %v532_v54, 0.0  ;;  %v577_v11 = vsel %vm540_vm4, %v539_v8, 0.0 }
  0xc9   : > { %557 = vadd.xlane.f32.xlu2 %v556_v59 }
  0xca   : > { %v506_v60 = vadd.f32 %v1551_v45, %v479_v58 }
  0xcc   : > { %v519_v63 = vmax.f32 %v506_v60, 0.0 }
  0xce   : > { %v411_v0 = vpop.f32.mrf.mxu0  ;;  %v533_v3 = vmul.f32 %v1557_v49, %v519_v63 }
  0xcf   : > { %v480_v4 = vpop.f32.mrf.mxu1 }
  0xd0   : > { %v481_v5 = vadd.f32 %v480_v4, %v411_v0  ;;  %v559_v6 = vsel %vm540_vm4, %v533_v3, 0.0 }
  0xd1   : > { %575 = vadd.xlane.f32.xlu2 %v574_v2  ;;  %560 = vadd.xlane.f32.xlu0 %v559_v6 }
  0xd2   : > { %v507_v7 = vadd.f32 %v1551_v45, %v481_v5 }
  0xd4   : > { %v520_v9 = vmax.f32 %v507_v7, 0.0 }
  0xd6   : > { %v534_v10 = vmul.f32 %v1557_v49, %v520_v9 }
  0xd8   : > { %v562_v12 = vsel %vm540_vm4, %v534_v10, 0.0 }
  0xd9   : > { %563 = vadd.xlane.f32.xlu1 %v562_v12  ;;  %578 = vadd.xlane.f32.xlu0 %v577_v11 }
  0xe1   : > { %572 = vadd.xlane.f32.xlu1 %v571_v33 }
 0x114   : > { %v543_v14 = vpop.xlane.xlu0 %542 }
 0x115   : > { %v582_v15 = vadd.f32 %v1597_v13, %v543_v14 }
 0x117   : > { %v1154_v16 = vmul.f32 -1.442695, %v582_v15 }
 0x119   : > { %1274 = vpow2.f32 %v1154_v16 }
 0x11c   : > { %v567_v45 = vpop.xlane.xlu2 %566  ;;  %v546_v17 = vpop.xlane.xlu0 %545 }
 0x11d   : > { %v590_v18 = vadd.f32 %v1597_v13, %v567_v45  ;;  %v583_v49 = vadd.f32 %v1597_v13, %v546_v17 }
 0x11f   : > { %v1162_v19 = vmul.f32 -1.442695, %v590_v18  ;;  %v1275_v20 = vpop.eup %1274  ;;  %v1155_v21 = vmul.f32 -1.442695, %v583_v49 }
 0x120   : > { %v634_v22 = vadd.f32 1.0, %v1275_v20 }
 0x121   : > { %1276 = vpow2.f32 %v1162_v19 }
 0x122   : > { %1278 = vpow2.f32 %v1155_v21  ;;  %v658_v36 = vand.u32 2147483648, %v634_v22  ;;  %v656_v39 = vand.u32 2147483647, %v634_v22  ;;  %vm652_vm6 = vweird.f32 %v634_v22 }
 0x123   : > { %1280 = vrcp.f32 %v634_v22 }
 0x124   : > { %v549_v23 = vpop.xlane.xlu1 %548  ;;  %v570_v24 = vpop.xlane.xlu0 %569  ;;  %v659_v46 = vor.u32 1.1754944e-38, %v658_v36  ;;  %vm657_vm9 = vcmp.eq.f32.partialorder %v656_v39, 8.507059e+37 }
 0x125   : > { %v584_v25 = vadd.f32 %v1597_v13, %v549_v23  ;;  %v591_v26 = vadd.f32 %v1597_v13, %v570_v24 }
 0x127   : > { %v1277_v27 = vpop.eup %1276  ;;  %v1156_v29 = vmul.f32 -1.442695, %v584_v25  ;;  %v1163_v33 = vmul.f32 -1.442695, %v591_v26 }
 0x128   : > { %v1279_v28 = vpop.eup %1278  ;;  %v1604_v30 = vadd.f32 1.0, %v1277_v27 }
 0x129   : > { %v1281_v31 = vpop.eup %1280  ;;  %v635_v32 = vadd.f32 1.0, %v1279_v28  ;;  %1282 = vpow2.f32 %v1156_v29 }
 0x12a   : > { %v648_v34 = vmul.f32 %v1281_v31, %v634_v22  ;;  %vm653_vm5 = vweird.f32 %v1281_v31  ;;  %vm772_vm10 = vweird.f32 %v1604_v30  ;;  %v776_v58 = vand.u32 2147483647, %v1604_v30 }
 0x12b   : > { %1284 = vrcp.f32 %v635_v32  ;;  %vm654_vm8 = vmor %vm652_vm6, %vm653_vm5  ;;  %v671_v55 = vand.u32 2147483647, %v635_v32  ;;  %v673_v56 = vand.u32 2147483648, %v635_v32  ;;  %v778_v59 = vand.u32 2147483648, %v1604_v30 }
 0x12c   : > { %v649_v35 = vsub.f32 1.0, %v648_v34  ;;  %1286 = vrcp.f32 %v1604_v30  ;;  %v552_v37 = vpop.xlane.xlu1 %551  ;;  %vm667_vm13 = vweird.f32 %v635_v32  ;;  %vm777_vm1 = vcmp.eq.f32.partialorder %v776_v58, 8.507059e+37 }
 0x12d   : > { %1288 = vpow2.f32 %v1163_v33  ;;  %v585_v40 = vadd.f32 %v1597_v13, %v552_v37  ;;  %vm672_vm15 = vcmp.eq.f32.partialorder %v671_v55, 8.507059e+37  ;;  %v674_v6 = vor.u32 1.1754944e-38, %v673_v56 }
 0x12e   : > { %v650_v38 = vmul.f32 %v1281_v31, %v649_v35  ;;  %v779_v8 = vor.u32 1.1754944e-38, %v778_v59 }
 0x12f   : > { %v1283_v41 = vpop.eup %1282  ;;  %v1157_v43 = vmul.f32 -1.442695, %v585_v40 }
 0x130   : > { %v651_v42 = vadd.f32 %v1281_v31, %v650_v38  ;;  %v1609_v47 = vadd.f32 1.0, %v1283_v41 }
 0x131   : > { %v1285_v44 = vpop.eup %1284  ;;  %1290 = vpow2.f32 %v1157_v43 }
 0x132   : > { %v1287_v48 = vpop.eup %1286  ;;  %v655_v50 = vsel %vm654_vm8, %v1281_v31, %v651_v42  ;;  %v663_v51 = vmul.f32 %v1285_v44, %v635_v32  ;;  %1292 = vrcp.f32 %v1609_v47  ;;  %vm668_vm11 = vweird.f32 %v1285_v44 }
 0x133   : > { %v1289_v52 = vpop.eup %1288  ;;  %v660_v53 = vsel %vm657_vm9, %v659_v46, %v655_v50  ;;  %v768_v57 = vmul.f32 %v1287_v48, %v1604_v30  ;;  %vm773_vm12 = vweird.f32 %v1287_v48  ;;  %vm669_vm14 = vmor %vm667_vm13, %vm668_vm11  ;;  %v688_v17 = vand.u32 2147483648, %v1609_v47 }
 0x134   : > { %843 = vst.msk [vmem:[%s1613_s23] sm:$0xff] %vm842_vm7, %v660_v53  ;;  %v664_v54 = vsub.f32 1.0, %v663_v51  ;;  %v643_v60 = vadd.f32 1.0, %v1289_v52  ;;  %v555_v61 = vpop.xlane.xlu2 %554  ;;  %vm1623_vm0 = vmor %vm772_vm10, %vm773_vm12  ;;  %v686_v20 = vand.u32 2147483647, %v1609_v47  ;;  %vm682_vm3 = vweird.f32 %v1609_v47 }
 0x135   : > { %v769_v63 = vsub.f32 1.0, %v768_v57  ;;  %v586_v0 = vadd.f32 %v1597_v13, %v555_v61  ;;  %v689_v28 = vor.u32 1.1754944e-38, %v688_v17 }
 0x136   : > { %v665_v62 = vmul.f32 %v1285_v44, %v664_v54  ;;  %1294 = vrcp.f32 %v643_v60  ;;  %vm787_vm4 = vweird.f32 %v643_v60  ;;  %v793_v22 = vand.u32 2147483648, %v643_v60 }
 0x137   : > { %v1291_v1 = vpop.eup %1290  ;;  %v770_v3 = vmul.f32 %v1287_v48, %v769_v63  ;;  %v1158_v4 = vmul.f32 -1.442695, %v586_v0  ;;  %v791_v26 = vand.u32 2147483647, %v643_v60  ;;  %vm687_vm8 = vcmp.eq.f32.partialorder %v686_v20, 8.507059e+37 }
 0x138   : > { %v666_v2 = vadd.f32 %v1285_v44, %v665_v62  ;;  %v1293_v5 = vpop.eup %1292  ;;  %v1627_v9 = vadd.f32 1.0, %v1291_v1  ;;  %v794_v36 = vor.u32 1.1754944e-38, %v793_v22 }
 0x139   : > { %v678_v11 = vmul.f32 %v1293_v5, %v1609_v47  ;;  %v771_v12 = vadd.f32 %v1287_v48, %v770_v3  ;;  %vm683_vm2 = vweird.f32 %v1293_v5  ;;  %vm792_vm10 = vcmp.eq.f32.partialorder %v791_v26, 8.507059e+37 }
 0x13a   : > { %v670_v10 = vsel %vm669_vm14, %v1285_v44, %v666_v2  ;;  %1296 = vrcp.f32 %v1627_v9  ;;  %vm684_vm6 = vmor %vm682_vm3, %vm683_vm2  ;;  %v701_v40 = vand.u32 2147483647, %v1627_v9  ;;  %v703_v41 = vand.u32 2147483648, %v1627_v9 }
 0x13b   : > { %v675_v14 = vsel %vm672_vm15, %v674_v6, %v670_v10  ;;  %v679_v15 = vsub.f32 1.0, %v678_v11  ;;  %v775_v16 = vsel %vm1623_vm0, %v1287_v48, %v771_v12  ;;  %1298 = vpow2.f32 %v1158_v4 }
 0x13c   : > { %844 = vst.msk [vmem:[%s1613_s23 + $0x8] sm:$0xff] %vm842_vm7, %v675_v14  ;;  %v1295_v45 = vpop.eup %1294  ;;  %v780_v18 = vsel %vm777_vm1, %v779_v8, %v775_v16  ;;  %v558_v49 = vpop.xlane.xlu2 %557  ;;  %vm697_vm12 = vweird.f32 %v1627_v9  ;;  %v704_v55 = vor.u32 1.1754944e-38, %v703_v41  ;;  %vm702_vm14 = vcmp.eq.f32.partialorder %v701_v40, 8.507059e+37 }
 0x13d   : > { %v680_v19 = vmul.f32 %v1293_v5, %v679_v15  ;;  %851 = vst.msk [vmem:[%s1613_s23 + $0x40] sm:$0xff] %vm842_vm7, %v780_v18  ;;  %v783_v21 = vmul.f32 %v1295_v45, %v643_v60  ;;  %v587_v23 = vadd.f32 %v1597_v13, %v558_v49  ;;  %vm788_vm5 = vweird.f32 %v1295_v45 }
 0x13e   : > { %vm1643_vm9 = vmor %vm787_vm4, %vm788_vm5 }
 0x13f   : > { %v681_v24 = vadd.f32 %v1293_v5, %v680_v19  ;;  %v784_v25 = vsub.f32 1.0, %v783_v21  ;;  %v1159_v29 = vmul.f32 -1.442695, %v587_v23 }
 0x140   : > { %v1297_v27 = vpop.eup %1296 }
 0x141   : > { %v1299_v30 = vpop.eup %1298  ;;  %v685_v31 = vsel %vm684_vm6, %v1293_v5, %v681_v24  ;;  %v785_v32 = vmul.f32 %v1295_v45, %v784_v25  ;;  %v693_v33 = vmul.f32 %v1297_v27, %v1627_v9  ;;  %1300 = vpow2.f32 %v1159_v29 }
 0x142   : > { %v690_v34 = vsel %vm687_vm8, %v689_v28, %v685_v31  ;;  %v638_v37 = vadd.f32 1.0, %v1299_v30  ;;  %vm698_vm11 = vweird.f32 %v1297_v27 }
 0x143   : > { %845 = vst.msk [vmem:[%s1613_s23 + $0x10] sm:$0xff] %vm842_vm7, %v690_v34  ;;  %v786_v38 = vadd.f32 %v1295_v45, %v785_v32  ;;  %v694_v39 = vsub.f32 1.0, %v693_v33  ;;  %vm699_vm13 = vmor %vm697_vm12, %vm698_vm11 }
 0x144   : > { %1302 = vrcp.f32 %v638_v37  ;;  %v576_v42 = vpop.xlane.xlu2 %575  ;;  %v561_v43 = vpop.xlane.xlu0 %560  ;;  %v718_v2 = vand.u32 2147483648, %v638_v37  ;;  %v716_v5 = vand.u32 2147483647, %v638_v37  ;;  %vm712_vm0 = vweird.f32 %v638_v37 }
 0x145   : > { %v790_v44 = vsel %vm1643_vm9, %v1295_v45, %v786_v38  ;;  %v695_v46 = vmul.f32 %v1297_v27, %v694_v39  ;;  %v593_v47 = vadd.f32 %v1597_v13, %v576_v42  ;;  %v588_v48 = vadd.f32 %v1597_v13, %v561_v43 }
 0x146   : > { %v795_v50 = vsel %vm792_vm10, %v794_v36, %v790_v44  ;;  %v719_v14 = vor.u32 1.1754944e-38, %v718_v2  ;;  %vm717_vm2 = vcmp.eq.f32.partialorder %v716_v5, 8.507059e+37 }
 0x147   : > { %852 = vst.msk [vmem:[%s1613_s23 + $0x48] sm:$0xff] %vm842_vm7, %v795_v50  ;;  %v696_v51 = vadd.f32 %v1297_v27, %v695_v46  ;;  %v1165_v52 = vmul.f32 -1.442695, %v593_v47  ;;  %v1160_v53 = vmul.f32 -1.442695, %v588_v48  ;;  %v1301_v54 = vpop.eup %1300 }
 0x148   : > { %v639_v57 = vadd.f32 1.0, %v1301_v54 }
 0x149   : > { %v700_v56 = vsel %vm699_vm13, %v1297_v27, %v696_v51  ;;  %1304 = vpow2.f32 %v1165_v52 }
 0x14a   : > { %v1303_v58 = vpop.eup %1302  ;;  %v705_v59 = vsel %vm702_vm14, %v704_v55, %v700_v56  ;;  %1306 = vpow2.f32 %v1160_v53  ;;  %v733_v49 = vand.u32 2147483648, %v639_v57  ;;  %v731_v20 = vand.u32 2147483647, %v639_v57 }
 0x14b   : > { %846 = vst.msk [vmem:[%s1613_s23 + $0x18] sm:$0xff] %vm842_vm7, %v705_v59  ;;  %v708_v60 = vmul.f32 %v1303_v58, %v638_v37  ;;  %1308 = vrcp.f32 %v639_v57  ;;  %vm713_vm15 = vweird.f32 %v1303_v58  ;;  %vm727_vm4 = vweird.f32 %v639_v57 }
 0x14c   : > { %v564_v61 = vpop.xlane.xlu1 %563  ;;  %v579_v62 = vpop.xlane.xlu0 %578  ;;  %vm714_vm1 = vmor %vm712_vm0, %vm713_vm15  ;;  %v734_v28 = vor.u32 1.1754944e-38, %v733_v49  ;;  %vm732_vm6 = vcmp.eq.f32.partialorder %v731_v20, 8.507059e+37 }
 0x14d   : > { %v709_v63 = vsub.f32 1.0, %v708_v60  ;;  %v589_v0 = vadd.f32 %v1597_v13, %v564_v61  ;;  %v594_v1 = vadd.f32 %v1597_v13, %v579_v62 }
 0x14f   : > { %v1305_v3 = vpop.eup %1304  ;;  %v710_v4 = vmul.f32 %v1303_v58, %v709_v63  ;;  %v1161_v6 = vmul.f32 -1.442695, %v589_v0  ;;  %v1166_v12 = vmul.f32 -1.442695, %v594_v1 }
 0x150   : > { %v1307_v7 = vpop.eup %1306  ;;  %v645_v8 = vadd.f32 1.0, %v1305_v3 }
 0x151   : > { %v1309_v9 = vpop.eup %1308  ;;  %v711_v10 = vadd.f32 %v1303_v58, %v710_v4  ;;  %v1663_v11 = vadd.f32 1.0, %v1307_v7  ;;  %1310 = vpow2.f32 %v1161_v6 }
 0x152   : > { %v723_v15 = vmul.f32 %v1309_v9, %v639_v57  ;;  %1312 = vrcp.f32 %v645_v8  ;;  %vm728_vm3 = vweird.f32 %v1309_v9  ;;  %v821_v38 = vand.u32 2147483647, %v645_v8 }
 0x153   : > { %v715_v16 = vsel %vm714_vm1, %v1303_v58, %v711_v10  ;;  %1314 = vrcp.f32 %v1663_v11  ;;  %vm729_vm5 = vmor %vm727_vm4, %vm728_vm3  ;;  %v748_v39 = vand.u32 2147483648, %v1663_v11  ;;  %v746_v41 = vand.u32 2147483647, %v1663_v11 }
 0x154   : > { %v720_v45 = vsel %vm717_vm2, %v719_v14, %v715_v16  ;;  %v724_v17 = vsub.f32 1.0, %v723_v15  ;;  %v573_v18 = vpop.xlane.xlu1 %572  ;;  %1316 = vpow2.f32 %v1166_v12  ;;  %vm817_vm10 = vweird.f32 %v645_v8 }
 0x155   : > { %847 = vst.msk [vmem:[%s1613_s23 + $0x20] sm:$0xff] %vm842_vm7, %v720_v45  ;;  %v592_v21 = vadd.f32 %v1597_v13, %v573_v18  ;;  %v823_v13 = vand.u32 2147483648, %v645_v8  ;;  %vm742_vm12 = vweird.f32 %v1663_v11  ;;  %vm822_vm13 = vcmp.eq.f32.partialorder %v821_v38, 8.507059e+37 }
 0x156   : > { %v725_v19 = vmul.f32 %v1309_v9, %v724_v17  ;;  %v749_v48 = vor.u32 1.1754944e-38, %v748_v39  ;;  %vm747_vm15 = vcmp.eq.f32.partialorder %v746_v41, 8.507059e+37 }
 0x157   : > { %v1311_v22 = vpop.eup %1310  ;;  %v1164_v26 = vmul.f32 -1.442695, %v592_v21  ;;  %v824_v44 = vor.u32 1.1754944e-38, %v823_v13 }
 0x158   : > { %v1313_v23 = vpop.eup %1312  ;;  %v726_v24 = vadd.f32 %v1309_v9, %v725_v19  ;;  %v641_v25 = vadd.f32 1.0, %v1311_v22 }
 0x159   : > { %v1315_v27 = vpop.eup %1314  ;;  %v813_v29 = vmul.f32 %v1313_v23, %v645_v8  ;;  %vm818_vm8 = vweird.f32 %v1313_v23 }
 0x15a   : > { %v730_v30 = vsel %vm729_vm5, %v1309_v9, %v726_v24  ;;  %v738_v31 = vmul.f32 %v1315_v27, %v1663_v11  ;;  %1318 = vrcp.f32 %v641_v25  ;;  %v1317_v32 = vpop.eup %1316  ;;  %vm743_vm9 = vweird.f32 %v1315_v27  ;;  %vm819_vm11 = vmor %vm817_vm10, %vm818_vm8 }
 0x15b   : > { %v735_v33 = vsel %vm732_vm6, %v734_v28, %v730_v30  ;;  %v814_v34 = vsub.f32 1.0, %v813_v29  ;;  %v646_v36 = vadd.f32 1.0, %v1317_v32  ;;  %1320 = vpow2.f32 %v1164_v26  ;;  %vm744_vm14 = vmor %vm742_vm12, %vm743_vm9 }
 0x15c   : > { %848 = vst.msk [vmem:[%s1613_s23 + $0x28] sm:$0xff] %vm842_vm7, %v735_v33  ;;  %v739_v35 = vsub.f32 1.0, %v738_v31  ;;  %v761_v58 = vand.u32 2147483647, %v641_v25  ;;  %v763_v59 = vand.u32 2147483648, %v641_v25  ;;  %vm757_vm1 = vweird.f32 %v641_v25 }
 0x15d   : > { %v815_v37 = vmul.f32 %v1313_v23, %v814_v34  ;;  %1322 = vrcp.f32 %v646_v36  ;;  %vm832_vm4 = vweird.f32 %v646_v36  ;;  %v838_v1 = vand.u32 2147483648, %v646_v36 }
 0x15e   : > { %v740_v40 = vmul.f32 %v1315_v27, %v739_v35  ;;  %vm762_vm3 = vcmp.eq.f32.partialorder %v761_v58, 8.507059e+37  ;;  %v764_v0 = vor.u32 1.1754944e-38, %v763_v59  ;;  %v836_v4 = vand.u32 2147483647, %v646_v36 }
 0x15f   : > { %v816_v42 = vadd.f32 %v1313_v23, %v815_v37  ;;  %v839_v8 = vor.u32 1.1754944e-38, %v838_v1 }
 0x160   : > { %v1319_v43 = vpop.eup %1318  ;;  %v741_v46 = vadd.f32 %v1315_v27, %v740_v40  ;;  %vm837_vm8 = vcmp.eq.f32.partialorder %v836_v4, 8.507059e+37 }
 0x161   : > { %v820_v47 = vsel %vm819_vm11, %v1313_v23, %v816_v42  ;;  %v753_v50 = vmul.f32 %v1319_v43, %v641_v25  ;;  %v1321_v51 = vpop.eup %1320  ;;  %vm758_vm0 = vweird.f32 %v1319_v43 }
 0x162   : > { %v825_v52 = vsel %vm822_vm13, %v824_v44, %v820_v47  ;;  %v745_v53 = vsel %vm744_vm14, %v1315_v27, %v741_v46  ;;  %v644_v56 = vadd.f32 1.0, %v1321_v51  ;;  %vm759_vm2 = vmor %vm757_vm1, %vm758_vm0 }
 0x163   : > { %854 = vst.msk [vmem:[%s1613_s23 + $0x58] sm:$0xff] %vm842_vm7, %v825_v52  ;;  %v750_v54 = vsel %vm747_vm15, %v749_v48, %v745_v53  ;;  %v754_v55 = vsub.f32 1.0, %v753_v50  ;;  %v1323_v57 = vpop.eup %1322 }
 0x164   : > { %849 = vst.msk [vmem:[%s1613_s23 + $0x30] sm:$0xff] %vm842_vm7, %v750_v54  ;;  %v828_v61 = vmul.f32 %v1323_v57, %v646_v36  ;;  %1324 = vrcp.f32 %v644_v56  ;;  %vm833_vm5 = vweird.f32 %v1323_v57  ;;  %v808_v14 = vand.u32 2147483648, %v644_v56 }
 0x165   : > { %v755_v60 = vmul.f32 %v1319_v43, %v754_v55  ;;  %vm834_vm6 = vmor %vm832_vm4, %vm833_vm5  ;;  %v806_v16 = vand.u32 2147483647, %v644_v56  ;;  %vm802_vm10 = vweird.f32 %v644_v56 }
 0x166   : > { %v829_v63 = vsub.f32 1.0, %v828_v61  ;;  %v809_v17 = vor.u32 1.1754944e-38, %v808_v14 }
 0x167   : > { %v756_v62 = vadd.f32 %v1319_v43, %v755_v60  ;;  %vm807_vm12 = vcmp.eq.f32.partialorder %v806_v16, 8.507059e+37 }
 0x168   : > { %v830_v3 = vmul.f32 %v1323_v57, %v829_v63 }
 0x169   : > { %v760_v2 = vsel %vm759_vm2, %v1319_v43, %v756_v62 }
 0x16a   : > { %v765_v5 = vsel %vm762_vm3, %v764_v0, %v760_v2  ;;  %v1325_v6 = vpop.eup %1324  ;;  %v831_v7 = vadd.f32 %v1323_v57, %v830_v3 }
 0x16b   : > { %850 = vst.msk [vmem:[%s1613_s23 + $0x38] sm:$0xff] %vm842_vm7, %v765_v5  ;;  %v798_v9 = vmul.f32 %v1325_v6, %v644_v56  ;;  %vm803_vm9 = vweird.f32 %v1325_v6 }
 0x16c   : > { %v835_v10 = vsel %vm834_vm6, %v1323_v57, %v831_v7  ;;  %vm804_vm11 = vmor %vm802_vm10, %vm803_vm9 }
 0x16d   : > { %v840_v11 = vsel %vm837_vm8, %v839_v8, %v835_v10  ;;  %v799_v12 = vsub.f32 1.0, %v798_v9 }
 0x16e   : > { %855 = vst.msk [vmem:[%s1613_s23 + $0x60] sm:$0xff] %vm842_vm7, %v840_v11 }
 0x16f   : > { %v800_v15 = vmul.f32 %v1325_v6, %v799_v12 }
 0x171   : > { %v801_v45 = vadd.f32 %v1325_v6, %v800_v15  ;;  %862 = sbr.rel (!%p1483_p4) target bundleno = 434 (0x1b2), region = 48 }
 0x173   : > { %v805_v18 = vsel %vm804_vm11, %v1325_v6, %v801_v45 }
 0x174   : > { %v810_v49 = vsel %vm807_vm12, %v809_v17, %v805_v18 }
 0x175   : > { %853 = vst.msk [vmem:[%s1613_s23 + $0x50] sm:$0xff] %vm842_vm7, %v810_v49 }
 0x176   : > { %s1799_s8 = smov (!%p865_p8, %s864_s8), 13 }
 0x177   : > { %s1167_s14 = sshll.u32 %s1799_s8, 3 }
 0x178   : > { %p1170_p9 = scmp.eq.s32.totalorder %s1167_s14, 0 }
 0x179   : > { %1326 = sdivrem.u32 (!%p1170_p9), %s1799_s8, 13 }
 0x17a   : > { %873 = sbr.rel (%p1170_p9) target bundleno = 434 (0x1b2), region = 52 }
 0x182   : > { %s1698_s30 = spop.drf %1326 }
 0x183   : > { %s1328_s15 = spop.drf %1326  ;;  %p1171_p10 = scmp.le.s32.totalorder %s1698_s30, 0 }
 0x184   : > { %s1790_s5 = smov (!%p1171_p10), %s1692_s13  ;;  %s1791_s11 = smov (!%p1171_p10), %s1613_s23 }
 0x185   : > { %1084 = sbr.rel (%p1171_p10) target bundleno = 408 (0x198), region = 131  ;;  %s1707_s16 = smov (!%p1171_p10), 0  }
 0x186   : > { %s1709_s17 = smov (!%p1171_p10), 0  }
 0x18a LB: >> { %v962_v19 = vld [vmem:[%s1394_s11] sm:$0xff]  ;;  %v964_v20 = vld [vmem:[%s1394_s11 + $0x8] sm:$0xff]  ;;  %v966_v21 = vld [vmem:[%s1394_s11 + $0x10] sm:$0xff]  ;;  %s988_s18 = sadd.s32 1, %s1398_s16  ;;  %s956_s17 = sadd.s32 1, %s1402_s17   ;;  %s1402_s17 = sphi %s1709_s17, %s956_s17   ;;  %s1398_s16 = sphi %s1707_s16, %s1794_s16   ;;  %s1394_s11 = sphi %s1791_s11, %s1793_s11   ;;  %s1390_s5 = sphi %s1790_s5, %s1792_s5  }
 0x18b   : >> { %963 = vst [vmem:[%s1390_s5] sm:$0xff] %v962_v19  ;;  %v968_v22 = vld [vmem:[%s1394_s11 + $0x18] sm:$0xff]  ;;  %p989_p11 = scmp.ge.s32.totalorder %s988_s18, %s1698_s30  ;;  %v970_v23 = vld [vmem:[%s1394_s11 + $0x20] sm:$0xff]  ;;  %v972_v24 = vld [vmem:[%s1394_s11 + $0x28] sm:$0xff]  ;;  %p955_p12 = scmp.ge.s32.totalorder %s956_s17, %s1698_s30 }
 0x18c   : >> { %965 = vst [vmem:[%s1390_s5 + $0x8] sm:$0xff] %v964_v20  ;;  %v974_v25 = vld [vmem:[%s1394_s11 + $0x30] sm:$0xff]  ;;  %v976_v26 = vld [vmem:[%s1394_s11 + $0x38] sm:$0xff]  ;;  %v978_v27 = vld [vmem:[%s1394_s11 + $0x40] sm:$0xff] }
 0x18d   : >> { %967 = vst [vmem:[%s1390_s5 + $0x10] sm:$0xff] %v966_v21  ;;  %s1801_s18 = smov (%p989_p11, %s988_s18), 0  ;;  %v980_v28 = vld [vmem:[%s1394_s11 + $0x48] sm:$0xff]  ;;  %v982_v29 = vld [vmem:[%s1394_s11 + $0x50] sm:$0xff]  ;;  %v984_v30 = vld [vmem:[%s1394_s11 + $0x58] sm:$0xff] }
 0x18e   : >> { %969 = vst [vmem:[%s1390_s5 + $0x18] sm:$0xff] %v968_v22  ;;  %s991_s19 = smul.u32 104, %s1801_s18  ;;  %v986_v31 = vld [vmem:[%s1394_s11 + $0x60] sm:$0xff]  ;;  %s1794_s16 = smov %s1801_s18 }
 0x18f   : >> { %971 = vst [vmem:[%s1390_s5 + $0x20] sm:$0xff] %v970_v23 }
 0x190   : >> { %973 = vst [vmem:[%s1390_s5 + $0x28] sm:$0xff] %v972_v24  ;;  %s993_s20 = scalar_lea.vmem %s1613_s23, %s991_s19 [#allocation3]   ;;  %s994_s21 = scalar_lea.vmem %s1692_s13, %s991_s19  }
 0x191   : >> { %975 = vst [vmem:[%s1390_s5 + $0x30] sm:$0xff] %v974_v25  ;;  %s1793_s11 = smov %s993_s20 }
 0x192   : >> { %977 = vst [vmem:[%s1390_s5 + $0x38] sm:$0xff] %v976_v26 }
 0x193   : >> { %979 = vst [vmem:[%s1390_s5 + $0x40] sm:$0xff] %v978_v27  ;;  %958 = sbr.rel (!%p955_p12) target bundleno = 394 (0x18a), region = 137 }
 0x194   : >> { %981 = vst [vmem:[%s1390_s5 + $0x48] sm:$0xff] %v980_v28 }
 0x195   : >> { %983 = vst [vmem:[%s1390_s5 + $0x50] sm:$0xff] %v982_v29 }
 0x196   : >> { %985 = vst [vmem:[%s1390_s5 + $0x58] sm:$0xff] %v984_v30 }
 0x197   : >> { %987 = vst [vmem:[%s1390_s5 + $0x60] sm:$0xff] %v986_v31  ;;  %s1792_s5 = smov %s994_s21 }
 0x198 PF: > { %1329 = sdivrem.u32 %s1799_s8, 13 }
 0x199   : > { %s1172_s22 = smul.u32 104, %s1698_s30 }
 0x19b   : > { %s1763_s25 = scalar_lea.vmem %s1613_s23, %s1172_s22 [#allocation3]   ;;  %s1001_s27 = scalar_lea.vmem %s1692_s13, %s1172_s22  }
 0x1a1   : > { %s1330_s28 = spop.drf %1329 }
 0x1a2   : > { %s1331_s7 = spop.drf %1329 }
 0x1a3   : > { %p1174_p13 = scmp.le.s32.totalorder %s1331_s7, 0 }
 0x1a4   : > { %s1404_s9 = smov (!%p1174_p13), %s1001_s27   ;;  %s1408_s10 = smov (!%p1174_p13), %s1763_s25  }
 0x1a5   : > { %1098 = sbr.rel (%p1174_p13) target bundleno = 434 (0x1b2), region = 142  ;;  %s1412_s12 = smov (!%p1174_p13), 0  }
 0x1a6   : > { %s1416_s14 = smov (!%p1174_p13), 0  }
 0x1aa LB: >> { %v1011_v32 = vld [vmem:[%s1410_s10] sm:$0xff]  ;;  %s1013_s23 = sadd.s32 1, %s1414_s12  ;;  %s1005_s14 = sadd.s32 1, %s1418_s14   ;;  %s1418_s14 = sphi %s1416_s14, %s1005_s14   ;;  %s1414_s12 = sphi %s1412_s12, %s1413_s12   ;;  %s1410_s10 = sphi %s1408_s10, %s1018_s10   ;;  %s1406_s9 = sphi %s1404_s9, %s1019_s9  }
 0x1ab   : >> { %1012 = vst [vmem:[%s1406_s9] sm:$0xff] %v1011_v32  ;;  %p1014_p0 = scmp.ge.s32.totalorder %s1013_s23, %s1331_s7  ;;  %p1004_p1 = scmp.ge.s32.totalorder %s1005_s14, %s1331_s7 }
 0x1ad   : >> { %s1803_s23 = smov (%p1014_p0, %s1013_s23), 0  ;;  %1007 = sbr.rel (!%p1004_p1) target bundleno = 426 (0x1aa), region = 148 }
 0x1ae   : >> { %s1175_s8 = sshll.u32 %s1803_s23, 3  ;;  %s1413_s12 = smov %s1803_s23  }
 0x1af   : >> { %s1018_s10 = scalar_lea.vmem %s1763_s25, %s1175_s8 [#allocation3]   ;;  %s1019_s9 = scalar_lea.vmem %s1001_s27, %s1175_s8  }
 0x1b2 PF: > { %p14_p2 = scmp.ge.s32.totalorder %s1473_s26, 4   ;;  %s1795_s23 = smov %s1382_s24 }
 0x1b3   : > { %s1796_s24 = smov %s1481_s29  ;;  %s1797_s25 = smov %s1473_s26 }
 0x1b4   :  { %16 = sbr.rel (!%p14_p2) target bundleno = 4 (0x4), region = 159 }

</bundles_post_ra>
